<compile_context>
chip_gen: v5e
topology: v5e:2x2
jax: 0.10.0
libtpu: 0.0.40
codegen_flags: <defaults>
</compile_context>

<pallas_src>
import functools

import jax
import jax.numpy as jnp
from jax.experimental import pallas as pl
from jax.experimental.pallas import tpu as pltpu

P_DROP = 0.2
_LANES = 128  # lane width: repack feature dim into full 128-wide lanes


def _dropout_kernel(x_ref, u_ref, o_ref, *, keep_prob):
    # Inverted dropout: keep where u < keep_prob, scale survivors by 1/keep_prob.
    x = x_ref[...]
    keep = u_ref[...] < jnp.float32(keep_prob)
    scale = jnp.float32(1.0 / keep_prob)
    o_ref[...] = (jnp.where(keep, x, jnp.float32(0.0)) * scale).astype(o_ref.dtype)


@functools.partial(jax.jit, static_argnames=("p",))
def dropout(x, key, p=P_DROP):
    """Training-mode Dropout(p) on a 2-D activation, via a single Pallas call."""
    keep_prob = 1.0 - p
    n, f = x.shape
    assert (n * f) % _LANES == 0, "feature count must repack into 128-wide lanes"
    rows = (n * f) // _LANES

    # Repack (1, 1280) -> (10, 128): sublane-dense layout (2 f32 vregs).
    x2 = x.reshape(rows, _LANES)
    # Per-call dropout randoms, generated on-device under the same jit.
    u = jax.random.uniform(key, (rows, _LANES), dtype=jnp.float32)

    out2 = pl.pallas_call(
        functools.partial(_dropout_kernel, keep_prob=keep_prob),
        out_shape=jax.ShapeDtypeStruct(x2.shape, x2.dtype),
        # Grid-free call: whole arrays placed in VMEM, kernel runs once.
        in_specs=[
            pl.BlockSpec(memory_space=pltpu.MemorySpace.VMEM),
            pl.BlockSpec(memory_space=pltpu.MemorySpace.VMEM),
        ],
        out_specs=pl.BlockSpec(memory_space=pltpu.MemorySpace.VMEM),
        # Dropout is elementwise -> safe to alias output onto x (inplace=True).
        input_output_aliases={0: 0},
    )(x2, u)

    return out2.reshape(n, f)


if __name__ == "__main__":
    key = jax.random.PRNGKey(0)
    kx, kd = jax.random.split(key)

    # Shape implied by the module: x544 = torch.randn([1, 1280])
    x = jax.random.normal(kx, (1, 1280), dtype=jnp.float32)

    out = jax.block_until_ready(dropout(x, kd))

    # Sanity checks: same shape/dtype; surviving elements scaled by 1/0.8;
    # empirical keep rate close to 0.8.
    assert out.shape == x.shape and out.dtype == x.dtype
    kept = out != 0.0
    scaled = jnp.where(kept, x / (1.0 - P_DROP), 0.0)
    assert jnp.allclose(jnp.where(kept, out, 0.0), scaled, rtol=1e-6, atol=1e-6)
    rate = float(jnp.mean(kept.astype(jnp.float32)))
    assert 0.6 < rate < 0.95, f"unexpected keep rate {rate}"

    print("KERNEL_OK")
</pallas_src>

<mosaic_0001>
module attributes {stable_mosaic.version = 11 : i64} {
  func.func @_dropout_kernel(%arg0: memref<10x128xf32, #tpu.memory_space<vmem>>, %arg1: memref<10x128xf32, #tpu.memory_space<vmem>>, %arg2: memref<10x128xf32, #tpu.memory_space<vmem>>) attributes {dimension_semantics = [], scalar_prefetch = 0 : i64, scratch_operands = 0 : i64, tpu.core_type = #tpu.core_type<tc>} {
    %c0 = arith.constant 0 : index
    %c0_0 = arith.constant 0 : index
    %0 = vector.load %arg0[%c0, %c0_0] : memref<10x128xf32, #tpu.memory_space<vmem>>, vector<10x128xf32>
    %c0_1 = arith.constant 0 : index
    %c0_2 = arith.constant 0 : index
    %1 = vector.load %arg1[%c0_1, %c0_2] : memref<10x128xf32, #tpu.memory_space<vmem>>, vector<10x128xf32>
    %cst = arith.constant 8.000000e-01 : f32
    %2 = vector.broadcast %cst : f32 to vector<10x128xf32>
    %3 = arith.cmpf olt, %1, %2 : vector<10x128xf32>
    %cst_3 = arith.constant 0.000000e+00 : f32
    %4 = vector.broadcast %cst_3 : f32 to vector<10x128xf32>
    %5 = arith.select %3, %0, %4 : vector<10x128xi1>, vector<10x128xf32>
    %cst_4 = arith.constant 1.250000e+00 : f32
    %6 = vector.broadcast %cst_4 : f32 to vector<10x128xf32>
    %7 = arith.mulf %5, %6 : vector<10x128xf32>
    %c0_5 = arith.constant 0 : index
    %c0_6 = arith.constant 0 : index
    %8 = vector.load %arg2[%c0_5, %c0_6] : memref<10x128xf32, #tpu.memory_space<vmem>>, vector<10x128xf32>
    tpu.vector_store %arg2[%c0_5, %c0_6], %7 {strides = array<i32>} : memref<10x128xf32, #tpu.memory_space<vmem>>, vector<10x128xf32>,
    return
  }
}

</mosaic_0001>

<bundles_post_ra>
// kernel: dropout.1
= control target key start
LH: loop header
LB: loop body
LE: loop exit
PB: predicated region body
PF: predicated region fallthrough
CT: control target
= control target key end

     0   :  { %s60_s0 = inlined_call_operand.vmem [shape: f32[10,128], index: 0, kind: input, shape index: {}, may-alias: {0,2}]   ;;  %s61_s1 = inlined_call_operand.vmem [shape: f32[10,128], index: 1, kind: input, shape index: {}]   ;;  %s62_s2 = inlined_call_operand.vmem [shape: f32[10,128], index: 2, kind: output, shape index: {}, may-alias: {0,2}]  }
   0x1   :  { %v11_v0 = vld [vmem:[%s60_s0] sm:$0xff]  ;;  %v12_v2 = vld [vmem:[%s60_s0 + $0x8] sm:$0x3] }
   0x2   :  { %v13_v1 = vld [vmem:[%s61_s1] sm:$0xff]  ;;  %v14_v3 = vld [vmem:[%s61_s1 + $0x8] sm:$0x3] }
   0x3   :  { %vm15_vm0 = vcmp.lt.f32.partialorder %v13_v1, 0.8  ;;  %vm16_vm1 = vcmp.lt.f32.partialorder %v14_v3, 0.8 }
   0x4   :  { %v17_v4 = vsel %vm15_vm0, %v11_v0, 0.0  ;;  %v18_v6 = vsel %vm16_vm1, %v12_v2, 0.0 }
   0x5   :  { %v19_v5 = vmul.f32 1.25, %v17_v4  ;;  %v20_v7 = vmul.f32 1.25, %v18_v6 }
   0x7   :  { %21 = vst [vmem:[%s62_s2] sm:$0xff] %v19_v5 }
   0x8   :  { %22 = vst [vmem:[%s62_s2 + $0x8] sm:$0x3] %v20_v7 }

</bundles_post_ra>
